<compile_context>
chip_gen: v5e
topology: v5e:2x2
jax: 0.10.0
libtpu: 0.0.40
codegen_flags: <defaults>
</compile_context>

<pallas_src>
import jax
import jax.numpy as jnp
from jax.experimental import pallas as pl
from jax.experimental.pallas import tpu as pltpu


def _identity_kernel(x_ref, o_ref):
    # Hot path of ResnetBlock.forward: y = x
    o_ref[...] = x_ref[...]


def _sublane_pack(dtype):
    """Rows per vreg sublane group for this dtype (f32:8, bf16:16, int8/fp8:32)."""
    itemsize = jnp.dtype(dtype).itemsize
    return {4: 8, 2: 16, 1: 32}.get(itemsize, 8)


def _vmem_capacity_bytes():
    try:
        return int(pltpu.get_tpu_info().vmem_capacity_bytes)
    except Exception:
        return 64 << 20  # conservative default (v7x-sized VMEM)


def _choose_2d_layout(shape, max_lanes=32768):
    """Flatten to [rows, cols] with cols lane-dense (multiple of 128) if possible."""
    total = 1
    for d in shape:
        total *= d
    hw = shape[-1] * shape[-2] if len(shape) >= 2 else shape[-1]
    if hw % 128 == 0 and hw <= max_lanes:
        cols = hw                       # NCHW-contiguous view, already lane-dense
    elif total % 128 == 0:
        # largest multiple-of-128 divisor of total, capped at max_lanes
        cols = 128
        k = min(max_lanes, total) // 128
        while k >= 1:
            cand = k * 128
            if total % cand == 0:
                cols = cand
                break
            k -= 1
    else:
        cols = hw                       # fallback: masked partial stores on last lanes
    rows = total // cols
    return rows, cols


def _choose_tiles(rows, cols, dtype):
    """Byte-budgeted (tile_rows, tile_cols) with generation-aware VMEM budget."""
    itemsize = jnp.dtype(dtype).itemsize
    sub = _sublane_pack(dtype)
    vmem = _vmem_capacity_bytes()
    # 4 buffers resident (2 in + 2 out double-buffers): 8 MiB/buffer on
    # 128-MiB-VMEM chips (v5e/v6e), 4 MiB/buffer on 64-MiB-VMEM chips (v7x).
    budget = (8 << 20) if vmem >= (128 << 20) else (4 << 20)

    if cols % 128 == 0 and cols * itemsize * sub > budget:
        # Huge lane dim (e.g. 512x512 spatial): tile columns too (2-D grid).
        tc = max(128, (budget // (sub * itemsize)) // 128 * 128)
        tc = min(tc, cols)
        tr = min(sub, rows)
    else:
        tc = cols
        tr_fit = budget // max(1, cols * itemsize)
        if tr_fit >= rows:
            tr = rows                   # whole array fits in one tile
        else:
            tr = max(sub, (tr_fit // sub) * sub)
            tr = min(tr, rows)
        # v7x has 2 TensorCores: avoid a single-step grid for non-trivial arrays.
        total_bytes = rows * cols * itemsize
        if pl.cdiv(rows, tr) == 1 and rows >= 2 * sub and total_bytes >= (1 << 20):
            half = pl.cdiv(rows, 2)
            tr = max(sub, pl.cdiv(half, sub) * sub)
    return tr, tc


def resnet_block_forward(x):
    """ResnetBlock.forward(x) == x, computed through a Pallas TPU kernel.

    x: [N, C, H, W] (any float dtype). NOTE: the mathematically optimal
    implementation is simply `return x`; the kernel exists for the exercise.
    """
    shape = x.shape
    rows, cols = _choose_2d_layout(shape)
    x2d = x.reshape(rows, cols)                       # pure layout glue, no compute

    tr, tc = _choose_tiles(rows, cols, x.dtype)
    itemsize = jnp.dtype(x.dtype).itemsize
    tile_bytes = tr * tc * itemsize
    # 4 double-buffered tiles + headroom; never reserve all of v7x's 64 MiB.
    vmem_limit = int(min(48 << 20, max(16 << 20, 4 * tile_bytes + (4 << 20))))

    if tc == cols:
        grid = (pl.cdiv(rows, tr),)
        in_specs = [pl.BlockSpec((tr, tc), lambda i: (i, 0))]
        out_specs = pl.BlockSpec((tr, tc), lambda i: (i, 0))
        dims = ("parallel",)
    else:
        grid = (pl.cdiv(rows, tr), pl.cdiv(cols, tc))
        in_specs = [pl.BlockSpec((tr, tc), lambda i, j: (i, j))]
        out_specs = pl.BlockSpec((tr, tc), lambda i, j: (i, j))
        dims = ("parallel", "parallel")

    out2d = pl.pallas_call(
        _identity_kernel,
        out_shape=jax.ShapeDtypeStruct((rows, cols), x2d.dtype),
        grid=grid,
        in_specs=in_specs,
        out_specs=out_specs,
        compiler_params=pltpu.CompilerParams(
            dimension_semantics=dims,                 # copy has no cross-step dep
            vmem_limit_bytes=vmem_limit,
        ),
    )(x2d)

    return out2d.reshape(shape)


# TODO(synk): the reference ResnetBlock defines no parameters (empty __init__),
# so there are no weights to initialize.

if __name__ == "__main__":
    key = jax.random.PRNGKey(0)
    x = jax.random.normal(key, (2, 4, 16, 16), dtype=jnp.float32)  # NCHW

    y = resnet_block_forward(x)
    y = jax.block_until_ready(y)

    assert y.shape == x.shape and y.dtype == x.dtype
    assert bool(jnp.array_equal(y, x))
    print("KERNEL_OK")
</pallas_src>

<mosaic_0001>
module attributes {stable_mosaic.version = 11 : i64} {
  func.func @_identity_kernel(%arg0: i32, %arg1: memref<8x256xf32, #tpu.memory_space<vmem>>, %arg2: memref<8x256xf32, #tpu.memory_space<vmem>>) attributes {dimension_semantics = [#tpu.dimension_semantics<parallel>], iteration_bounds = array<i64: 1>, scalar_prefetch = 0 : i64, scratch_operands = 0 : i64, tpu.core_type = #tpu.core_type<tc>, window_params = [{transform_indices = @transform_0, window_bounds = array<i64: 8, 256>}, {transform_indices = @transform_1, window_bounds = array<i64: 8, 256>}]} {
    %c0 = arith.constant 0 : index
    %c0_0 = arith.constant 0 : index
    %0 = vector.load %arg1[%c0, %c0_0] : memref<8x256xf32, #tpu.memory_space<vmem>>, vector<8x256xf32>
    %c0_1 = arith.constant 0 : index
    %c0_2 = arith.constant 0 : index
    %1 = vector.load %arg2[%c0_1, %c0_2] : memref<8x256xf32, #tpu.memory_space<vmem>>, vector<8x256xf32>
    tpu.vector_store %arg2[%c0_1, %c0_2], %0 {strides = array<i32>} : memref<8x256xf32, #tpu.memory_space<vmem>>, vector<8x256xf32>,
    return
  }
  func.func @transform_0(%arg0: i32) -> (i32, i32) {
    %c0_i32 = arith.constant 0 : i32
    %c0_i32_0 = arith.constant 0 : i32
    return %arg0, %c0_i32 : i32, i32
  }
  func.func @transform_1(%arg0: i32) -> (i32, i32) {
    %c0_i32 = arith.constant 0 : i32
    %c0_i32_0 = arith.constant 0 : i32
    return %arg0, %c0_i32 : i32, i32
  }
}

</mosaic_0001>

<bundles_post_ra>
// kernel: tpu_custom_call.1
= control target key start
LH: loop header
LB: loop body
LE: loop exit
PB: predicated region body
PF: predicated region fallthrough
CT: control target
= control target key end

     0   :  { %6 = vsyncpa [#allocation3], 0  ;;  %s116_s0 = inlined_call_operand.hbm [shape: f32[8,256], index: 0, kind: input, shape index: {}]   ;;  %s117_s1 = inlined_call_operand.hbm [shape: f32[8,256], index: 1, kind: output, shape index: {}]  }
   0x1   :  { %7 = vsyncpa [#allocation4], 0  ;;  %s13_s8 = sshll.u32 %s116_s0, 4  ;;  %s98_s9 = smov [#allocation2]   ;;  %s14_s8 = int_to_ptr.hbm [resolvable:$true] %s13_s8 }
   0x2   :  { %s15_s10 = sshll.u32 %s98_s9, 4  ;;  %s16_s10 = int_to_ptr.vmem [resolvable:$true] %s15_s10 }
   0x3   :  { %18 = dma.hbm_to_vmem [thread:$0]  %s14_s8, 256, %s16_s10, [#allocation3]  }
   0x4   :  { %94 = dma.done.wait [#allocation3], 256  }
   0x5   :  { %95 = vsyncadd [#allocation3], 4294967040  ;;  %s99_s11 = smov [#allocation5]   ;;  %s34_s15 = sshll.u32 %s117_s1, 4  ;;  %v23_v0 = vld [vmem:[#allocation2] sm:$0xff]  ;;  %v24_v1 = vld [vmem:[#allocation2 + $0x8] sm:$0xff]  ;;  %s35_s15 = int_to_ptr.hbm [resolvable:$true] %s34_s15 }
   0x6   :  { %s32_s12 = sshll.u32 %s99_s11, 4  ;;  %25 = vst [vmem:[#allocation5] sm:$0xff] %v23_v0  ;;  %s33_s12 = int_to_ptr.vmem [resolvable:$true] %s32_s12 }
   0x7   :  { %26 = vst [vmem:[#allocation5 + $0x8] sm:$0xff] %v24_v1 }
   0x8   :  { %37 = dma.vmem_to_hbm [thread:$0]  %s33_s12, 256, %s35_s15, [#allocation4]  }
   0x9   :  { %96 = dma.done.wait [#allocation4], 256  }
   0xa   :  { %97 = vsyncadd [#allocation4], 4294967040 }
   0xb   :  { %42 = vsyncpa [#allocation3], 1 }
   0xc   :  { %43 = vsyncpa [#allocation4], 1 }

</bundles_post_ra>
